<compile_context>
chip_gen: v7x
topology: tpu7x:2x2x1
jax: 0.10.0
libtpu: 0.0.40
codegen_flags: <defaults>
</compile_context>

<pallas_src>
import math

import jax
import jax.numpy as jnp
from jax.experimental import pallas as pl
from jax.experimental.pallas import tpu as pltpu

_LANES = 128
_MIN_PALLAS_BYTES = 256 * 1024            # below this, XLA's fused add wins
_VMEM_LIMIT_BYTES = 32 * 1024 * 1024      # fits v7x's 64 MiB physical VMEM


def _round_up(v: int, m: int) -> int:
    return -(-v // m) * m


def _build_pe(embed_dim: int, max_len: int = 5000, dtype=jnp.float32) -> jnp.ndarray:
    """Deterministic sinusoidal table, identical to the PyTorch __init__.

    Pre-cast to the activation dtype (it's a registered buffer) so the hot
    path never pays a per-call convert+copy through HBM.
    """
    position = jnp.arange(0, max_len, dtype=jnp.float32)[:, None]             # (max_len, 1)
    div_term = jnp.exp(
        jnp.arange(0, embed_dim, 2, dtype=jnp.float32)
        * (-math.log(10000.0) / embed_dim)
    )                                                                          # (ceil(D/2),)
    angles = position * div_term                                               # (max_len, ceil(D/2))
    pe = jnp.zeros((max_len, embed_dim), dtype=jnp.float32)
    pe = pe.at[:, 0::2].set(jnp.sin(angles))
    pe = pe.at[:, 1::2].set(jnp.cos(angles)[:, : embed_dim // 2])
    return pe.astype(dtype)[None]                                              # (1, max_len, D)


def _target_tile_bytes() -> int:
    """Per-buffer tile target, generation-aware."""
    try:
        kind = jax.devices()[0].device_kind.lower()
    except Exception:  # pragma: no cover - defensive
        kind = ""
    # v5e (~0.82 TB/s): 2 MiB already amortizes the ~0.35us/step overhead.
    # v6e/v7x (1.4-3.2 TB/s): 4 MiB keeps per-step overhead <~10%.
    if "v5" in kind:
        return 2 * 1024 * 1024
    return 4 * 1024 * 1024


def _add_pe_kernel(x_ref, pe_ref, o_ref):
    # x_ref: (B_blk, tr, 128), pe_ref: (1, tr, 128) -> pure VPU broadcast-add.
    # HBM DMA (handled by the BlockSpec pipeline) is the binding resource.
    o_ref[...] = x_ref[...] + pe_ref[...]


def positional_encoding(x: jnp.ndarray, pe: jnp.ndarray,
                        *, min_pallas_bytes: int = _MIN_PALLAS_BYTES) -> jnp.ndarray:
    """x: (B, S, D); pe: (1, max_len, D) buffer.  Returns x + pe[:, :S, :]."""
    B, S, D = x.shape
    max_len = pe.shape[1]
    if S > max_len:
        raise ValueError(f"sequence length {S} exceeds positional table max_len {max_len}")
    if pe.dtype != x.dtype:
        # Prefer building the buffer in the activation dtype (see _build_pe).
        pe = pe.astype(x.dtype)

    itemsize = jnp.dtype(x.dtype).itemsize
    n = S * D
    total_bytes = B * n * itemsize

    if total_bytes < min_pallas_bytes or n % _LANES != 0:
        # Tiny inputs: fixed pallas_call/grid overhead dominates.
        # Non-lane-dense shapes (S*D % 128 != 0) would force masked vst.msk
        # stores at <=D/128 lane utilization -> XLA's fused add is the better
        # tool for both, so only the lane-dense Pallas path is shipped.
        return x + pe[:, :S, :]

    # ---------------- lane-dense Pallas path ----------------
    R = n // _LANES                             # rows of 128 lanes per batch element
    sub = max(8, 8 * (4 // itemsize))           # sublane multiple: 8 f32 / 16 bf16 / 32 int8

    # Positional table as a lane-dense view.  When max_len*D is 128-aligned we
    # pass the FULL buffer (reshape = free bitcast) and let the index_map
    # restrict reads to the first R row-blocks -> no per-call slice copy.
    if (max_len * D) % _LANES == 0 and R >= sub:
        pe_lane = pe.reshape(1, (max_len * D) // _LANES, _LANES)
    else:
        # Awkward/tiny case: one-time slice of exactly S rows (negligible here).
        pe_lane = pe[:, :S, :].reshape(1, R, _LANES)
    pe_rows = pe_lane.shape[1]

    x2 = x.reshape(B, R, _LANES)                # free view: contiguous trailing dims

    fold_batch = B <= 4
    target = _target_tile_bytes()
    row_bytes = _LANES * itemsize * (B if fold_batch else 1)
    tr_max = max(sub, (target // row_bytes) // sub * sub)

    if R <= tr_max:
        # Single row-tile.  tr == R (full dim) is always legal for x; for the
        # full pe table it also needs to be a sublane multiple, else round
        # down (trailing partial x block handled by Pallas' masked writeback).
        tr = R if (R % sub == 0 or pe_rows == R) else (R // sub) * sub
    else:
        # Balanced tiling: avoids a tiny trailing block with a half-empty DMA.
        n_tiles = pl.cdiv(R, tr_max)
        tr = _round_up(pl.cdiv(R, n_tiles), sub)

    compiler_params = pltpu.CompilerParams(
        dimension_semantics=("parallel",) if fold_batch else ("parallel", "arbitrary"),
        vmem_limit_bytes=_VMEM_LIMIT_BYTES,
    )

    if fold_batch:
        # Small batch folded into the block: B x fewer grid steps, pe read
        # exactly once per row tile, single grid axis for v7x megacore.
        grid_spec = pltpu.PrefetchScalarGridSpec(
            num_scalar_prefetch=0,
            grid=(pl.cdiv(R, tr),),
            in_specs=[
                pl.BlockSpec((B, tr, _LANES), lambda r: (0, r, 0)),    # x
                pl.BlockSpec((1, tr, _LANES), lambda r: (0, r, 0)),    # pe (full table; index_map limits reads)
            ],
            out_specs=pl.BlockSpec((B, tr, _LANES), lambda r: (0, r, 0)),
        )
    else:
        # Larger batch: batch innermost so the b-invariant pe index_map lets
        # Pallas skip the pe DMA on consecutive batch steps; the outer
        # "parallel" row axis is the one v7x megacore shards.
        grid_spec = pltpu.PrefetchScalarGridSpec(
            num_scalar_prefetch=0,
            grid=(pl.cdiv(R, tr), B),
            in_specs=[
                pl.BlockSpec((1, tr, _LANES), lambda r, b: (b, r, 0)),  # x
                pl.BlockSpec((1, tr, _LANES), lambda r, b: (0, r, 0)),  # pe (b-invariant)
            ],
            out_specs=pl.BlockSpec((1, tr, _LANES), lambda r, b: (b, r, 0)),
        )

    out2 = pl.pallas_call(
        _add_pe_kernel,
        out_shape=jax.ShapeDtypeStruct((B, R, _LANES), x.dtype),
        grid_spec=grid_spec,
        compiler_params=compiler_params,
    )(x2, pe_lane)
    return out2.reshape(B, S, D)


if __name__ == "__main__":
    key = jax.random.PRNGKey(0)
    k1, k2, k3, k4 = jax.random.split(key, 4)

    # 1) Module-natural small shape (B=2, S=8, D=32, default max_len=5000).
    #    First call takes the tiny-input XLA shortcut; second call forces the
    #    Pallas lane-dense path to exercise the kernel at this shape too.
    B, S, D = 2, 8, 32
    pe = _build_pe(D)                       # (1, 5000, 32), f32
    x = jax.random.normal(k1, (B, S, D), dtype=jnp.float32)
    ref = x + pe[:, :S, :]
    out = jax.block_until_ready(positional_encoding(x, pe))
    assert out.shape == (B, S, D)
    assert jnp.allclose(out, ref, atol=1e-6), "mismatch (XLA shortcut path)"
    out = jax.block_until_ready(positional_encoding(x, pe, min_pallas_bytes=0))
    assert jnp.allclose(out, ref, atol=1e-6), "mismatch (tiny forced Pallas path)"

    # 2) Bandwidth-shaped case: multi-tile grid, partial trailing row tile,
    #    full-table pe view (no per-call slice copy), batch folded into block.
    B2, S2, D2 = 2, 4104, 128
    pe2 = _build_pe(D2, max_len=4200)
    x2 = jax.random.normal(k2, (B2, S2, D2), dtype=jnp.float32)
    out2 = jax.block_until_ready(positional_encoding(x2, pe2))
    assert jnp.allclose(out2, x2 + pe2[:, :S2, :], atol=1e-6), "mismatch (multi-tile path)"

    # 3) Larger-batch branch: grid=(row_tiles, B), b-invariant pe DMA reuse.
    B3, S3, D3 = 6, 64, 128
    pe3 = _build_pe(D3, max_len=256)
    x3 = jax.random.normal(k3, (B3, S3, D3), dtype=jnp.float32)
    out3 = jax.block_until_ready(positional_encoding(x3, pe3, min_pallas_bytes=0))
    assert jnp.allclose(out3, x3 + pe3[:, :S3, :], atol=1e-6), "mismatch (batched-grid path)"

    # 4) Non-lane-dense shape (S*D % 128 != 0) -> deliberate XLA fallback.
    B4, S4, D4 = 2, 6, 20
    pe4 = _build_pe(D4, max_len=64)
    x4 = jax.random.normal(k4, (B4, S4, D4), dtype=jnp.float32)
    out4 = jax.block_until_ready(positional_encoding(x4, pe4, min_pallas_bytes=0))
    assert jnp.allclose(out4, x4 + pe4[:, :S4, :], atol=1e-6), "mismatch (XLA fallback path)"

    print("KERNEL_OK")
</pallas_src>

<mosaic_0001>
module attributes {stable_mosaic.version = 11 : i64} {
  func.func @_add_pe_kernel(%arg0: i32, %arg1: memref<2x2x128xf32, #tpu.memory_space<vmem>>, %arg2: memref<1x2x128xf32, #tpu.memory_space<vmem>>, %arg3: memref<2x2x128xf32, #tpu.memory_space<vmem>>) attributes {dimension_semantics = [#tpu.dimension_semantics<parallel>], iteration_bounds = array<i64: 1>, scalar_prefetch = 0 : i64, scratch_operands = 0 : i64, tpu.core_type = #tpu.core_type<tc>, window_params = [{transform_indices = @transform_0, window_bounds = array<i64: 2, 2, 128>}, {transform_indices = @transform_1, window_bounds = array<i64: 1, 2, 128>}, {transform_indices = @transform_2, window_bounds = array<i64: 2, 2, 128>}]} {
    %c0 = arith.constant 0 : index
    %c0_0 = arith.constant 0 : index
    %c0_1 = arith.constant 0 : index
    %0 = vector.load %arg1[%c0, %c0_0, %c0_1] : memref<2x2x128xf32, #tpu.memory_space<vmem>>, vector<2x2x128xf32>
    %c0_2 = arith.constant 0 : index
    %c0_3 = arith.constant 0 : index
    %c0_4 = arith.constant 0 : index
    %1 = vector.load %arg2[%c0_2, %c0_3, %c0_4] : memref<1x2x128xf32, #tpu.memory_space<vmem>>, vector<1x2x128xf32>
    %2 = vector.broadcast %1 : vector<1x2x128xf32> to vector<2x2x128xf32>
    %3 = arith.addf %0, %2 : vector<2x2x128xf32>
    %c0_5 = arith.constant 0 : index
    %c0_6 = arith.constant 0 : index
    %c0_7 = arith.constant 0 : index
    %4 = vector.load %arg3[%c0_5, %c0_6, %c0_7] : memref<2x2x128xf32, #tpu.memory_space<vmem>>, vector<2x2x128xf32>
    tpu.vector_store %arg3[%c0_5, %c0_6, %c0_7], %3 {strides = array<i32>} : memref<2x2x128xf32, #tpu.memory_space<vmem>>, vector<2x2x128xf32>,
    return
  }
  func.func @transform_0(%arg0: i32) -> (i32, i32, i32) {
    %c0_i32 = arith.constant 0 : i32
    %c0_i32_0 = arith.constant 0 : i32
    %c0_i32_1 = arith.constant 0 : i32
    return %c0_i32, %arg0, %c0_i32_0 : i32, i32, i32
  }
  func.func @transform_1(%arg0: i32) -> (i32, i32, i32) {
    %c0_i32 = arith.constant 0 : i32
    %c0_i32_0 = arith.constant 0 : i32
    %c0_i32_1 = arith.constant 0 : i32
    return %c0_i32, %arg0, %c0_i32_0 : i32, i32, i32
  }
  func.func @transform_2(%arg0: i32) -> (i32, i32, i32) {
    %c0_i32 = arith.constant 0 : i32
    %c0_i32_0 = arith.constant 0 : i32
    %c0_i32_1 = arith.constant 0 : i32
    return %c0_i32, %arg0, %c0_i32_0 : i32, i32, i32
  }
}

</mosaic_0001>

<bundles_post_ra>
// kernel: tpu_custom_call.1
= control target key start
LH: loop header
LB: loop body
LE: loop exit
PB: predicated region body
PF: predicated region fallthrough
CT: control target
= control target key end

     0   :  { %7 = vsyncpa [#allocation3], 0  ;;  %s154_s0 = inlined_call_operand.hbm [shape: f32[2,2,128], index: 0, kind: input, shape index: {}]   ;;  %s155_s1 = inlined_call_operand.vmem [shape: f32[1,2,128], index: 1, kind: input, shape index: {}]   ;;  %s156_s2 = inlined_call_operand.hbm [shape: f32[2,2,128], index: 2, kind: output, shape index: {}]  }
   0x1   :  { %8 = vsyncpa [#allocation4], 0  ;;  %s102_s9 = smov [#allocation2]   ;;  %s54_s13 = scalar_lea.hbm %s154_s0, 64 }
   0x2   :  { %s14_s10 = sshll.u32 %s102_s9, 4  ;;  %p55_p0 = scmp.ne.s32.totalorder %s154_s0, %s54_s13  ;;  %s15_s10 = int_to_ptr.vmem [resolvable:$true] %s14_s10 }
   0x3   :  { %p58_p1 = scmp.lt.u32.totalorder %s54_s13, %s154_s0 }
   0x5   :  { %p60_p2 = pnand %p58_p1, %p55_p0 }
   0x7   :  { %63 = shalt.err (!%p60_p2)
}
   0x8   :  { %s64_s18 = scalar_lea.vmem %s15_s10, 64  ;;  %p69_p4 = scmp.lt.s32.totalorder %s15_s10, %s15_s10 }
   0x9   :  { %p65_p3 = scmp.ne.s32.totalorder %s15_s10, %s64_s18  ;;  %p70_p5 = scmp.lt.s32.totalorder %s64_s18, %s64_s18 }
   0xb   :  { %p71_p6 = por %p70_p5, %p69_p4 }
   0xd   :  { %p72_p7 = pnand %p71_p6, %p65_p3 }
   0xf   :  { %75 = shalt.err (!%p72_p7)
}
  0x10   :  { %s103_s19 = smov 32   ;;  %s104_s20 = smov 2  }
  0x11   :  { %20 = dma.hbm_to_vmem [thread:$0]  %s154_s0, 64, %s15_s10, [#allocation3], %s103_s19, %s103_s19, %s104_s20  }
  0x12   :  { %98 = dma.done.wait [#allocation3], 64  }
  0x13   :  { %99 = vsyncadd [#allocation3], 4294967232  ;;  %s105_s23 = smov [#allocation5]   ;;  %v26_v0 = vld [vmem:[#allocation2] sm:$0x3] }
  0x14   :  { %s38_s24 = sshll.u32 %s105_s23, 4  ;;  %v28_v1 = vld [vmem:[%s155_s1] sm:$0x3]  ;;  %v27_v2 = vld [vmem:[#allocation2 + $0x2] sm:$0x3]  ;;  %s39_s24 = int_to_ptr.vmem [resolvable:$true] %s38_s24 }
  0x15   :  { %v29_v3 = vadd.f32 %v28_v1, %v26_v0  ;;  %v30_v4 = vadd.f32 %v28_v1, %v27_v2  ;;  %s76_s27 = scalar_lea.vmem %s39_s24, 64  ;;  %p81_p9 = scmp.lt.s32.totalorder %s39_s24, %s39_s24 }
  0x16   :  { %p77_p8 = scmp.ne.s32.totalorder %s39_s24, %s76_s27  ;;  %p82_p10 = scmp.lt.s32.totalorder %s76_s27, %s76_s27 }
  0x17   :  { %31 = vst [vmem:[#allocation5] sm:$0x3] %v29_v3  ;;  %32 = vst [vmem:[#allocation5 + $0x2] sm:$0x3] %v30_v4 }
  0x18   :  { %p83_p11 = por %p82_p10, %p81_p9 }
  0x1a   :  { %p84_p12 = pnand %p83_p11, %p77_p8 }
  0x1c   :  { %87 = shalt.err (!%p84_p12)
}
  0x1d   :  { %s88_s29 = scalar_lea.hbm %s156_s2, 64 }
  0x1e   :  { %p89_p13 = scmp.ne.s32.totalorder %s156_s2, %s88_s29  ;;  %p92_p0 = scmp.lt.u32.totalorder %s88_s29, %s156_s2 }
  0x20   :  { %p94_p1 = pnand %p92_p0, %p89_p13 }
  0x22   :  { %97 = shalt.err (!%p94_p1)
}
  0x23   :  { %44 = dma.vmem_to_hbm [thread:$0]  %s39_s24, 64, %s156_s2, [#allocation4], %s103_s19, %s103_s19, %s104_s20  }
  0x24   :  { %100 = dma.done.wait [#allocation4], 64  }
  0x25   :  { %101 = vsyncadd [#allocation4], 4294967232 }
  0x26   :  { %48 = vsyncpa [#allocation3], 1 }
  0x27   :  { %49 = vsyncpa [#allocation4], 1 }

</bundles_post_ra>
